<compile_context>
chip_gen: v7x
topology: tpu7x:2x2x1
jax: 0.10.0
libtpu: 0.0.40
codegen_flags: <defaults>
</compile_context>

<pallas_src>
import functools

import jax
import jax.numpy as jnp
from jax.experimental import pallas as pl
from jax.experimental.pallas import tpu as pltpu

# ----------------------------- config (mirrors __init__ defaults) ------------------
LAMBDA_RESOURCE = 0.01
MEMORY_COST_BASE = 1.0
RECOMPUTATION_COST_BASE = 2.0
IGNORE_INDEX = -100
NORMALIZE_COSTS = True
NUM_SPLITS = 2  # leading "parallel" grid axis (uses both TensorCores on v7x)


# ----------------------------- Pallas kernel ---------------------------------------
def _ce_kernel(logits_ref, targets_ref, sum_ref, cnt_ref, m_ref, s_ref, tgt_ref,
               *, n_rows, n_cols, tile_n, tile_v, rt_per_split, v_ragged):
    """Row-tiled, vocab-streamed (online-LSE) cross-entropy partial sums.

    logits_ref : (tile_n, tile_v) caller dtype (VMEM)
    targets_ref: (tile_n, 1)      int32 (VMEM, resident across vocab tiles)
    sum_ref    : (1, 1) f32 output block (per-core partial loss sum)
    cnt_ref    : (1, 1) f32 output block (per-core partial valid-row count)
    m_ref      : (tile_n, 1) f32 scratch (running row max)
    s_ref      : (tile_n, 1) f32 scratch (running exp sum)
    tgt_ref    : (tile_n, 1) f32 scratch (accumulated target logit)
    """
    c = pl.program_id(0)      # core split (parallel)
    i = pl.program_id(1)      # row tile within split (arbitrary)
    k = pl.program_id(2)      # vocab tile (arbitrary)
    nk = pl.num_programs(2)

    # per-core partial accumulator init (output block stays resident for this core)
    @pl.when(jnp.logical_and(i == 0, k == 0))
    def _init_out():
        sum_ref[...] = jnp.zeros_like(sum_ref)
        cnt_ref[...] = jnp.zeros_like(cnt_ref)

    # per-row-tile online-LSE state init
    @pl.when(k == 0)
    def _init_row_state():
        m_ref[...] = jnp.full_like(m_ref, jnp.finfo(jnp.float32).min)
        s_ref[...] = jnp.zeros_like(s_ref)
        tgt_ref[...] = jnp.zeros_like(tgt_ref)

    x = logits_ref[...]                                   # native dtype (bf16 welcome)
    t = targets_ref[...]                                  # (tile_n, 1) int32

    col = jax.lax.broadcasted_iota(jnp.int32, x.shape, 1) + k * tile_v
    if v_ragged:
        # ragged last vocab tile: pad columns carry garbage -> push to dtype-min so
        # they never win the max and their exp underflows to exactly 0
        neg_fill = jnp.asarray(jnp.finfo(x.dtype).min, dtype=x.dtype)
        x = jnp.where(col < n_cols, x, neg_fill)

    # running max: max/compare stay in the native dtype, only the (tile_n,1) result is f32
    tile_max = jnp.max(x, axis=-1, keepdims=True).astype(jnp.float32)
    m_old = m_ref[...]
    m_new = jnp.maximum(m_old, tile_max)

    # exp path in f32 (arguments <= 0 after the max-subtract)
    p = jnp.exp(x.astype(jnp.float32) - m_new)            # (tile_n, tile_v) f32 temp
    s_ref[...] = s_ref[...] * jnp.exp(m_old - m_new) + jnp.sum(p, axis=-1, keepdims=True)
    m_ref[...] = m_new

    # target-logit gather: iota compare (VPU, native dtype) + lane reduce (XLU)
    match = col == t
    tgt_ref[...] += jnp.sum(jnp.where(match, x, jnp.zeros((), x.dtype)),
                            axis=-1, keepdims=True).astype(jnp.float32)

    @pl.when(k == nk - 1)
    def _finish_rows():
        lse = m_ref[...] + jnp.log(s_ref[...])             # (tile_n, 1)
        per_row = lse - tgt_ref[...]                       # NLL per row

        # mask: rows past n_rows (ragged / fully-OOB tiles read clamped/garbage data)
        # and ignore_index rows.  MUST stay a select, not a multiply (garbage -> NaN).
        row = (jax.lax.broadcasted_iota(jnp.int32, per_row.shape, 0)
               + (c * rt_per_split + i) * tile_n)
        valid = jnp.logical_and(row < n_rows, t != IGNORE_INDEX)

        sum_ref[...] += jnp.sum(jnp.where(valid, per_row, 0.0))
        cnt_ref[...] += jnp.sum(jnp.where(valid, 1.0, 0.0))


# ----------------------------- tiling heuristics ------------------------------------
def _device_vmem_capacity_bytes():
    try:
        info = pltpu.get_tpu_info()
        cap = getattr(info, "vmem_capacity_bytes", None)
        if cap:
            return int(cap)
    except Exception:
        pass
    return 64 * 1024 * 1024  # conservative (v7x-sized) default, safe everywhere


def _choose_tiling(n, v, itemsize):
    """Generation-aware tile sizes + vmem limit.

    Working-set estimate per grid step:
      2 pipelined input buffers (caller dtype) + ~3x tile in f32 (x-m, exp temporaries).
    """
    cap = _device_vmem_capacity_bytes()                     # 128 MiB v5e/v6e, 64 MiB v7x
    vmem_limit = max(32 * 1024 * 1024, min(int(cap * 0.6), 96 * 1024 * 1024))
    budget = int(vmem_limit * 0.7)                          # headroom for scratch/outputs

    row_mult = {4: 8, 2: 16, 1: 32}.get(itemsize, 8)        # sublane packing per dtype
    work_bytes = 2 * itemsize + 12                          # per logits element

    # vocab tile: keep the whole vocab if >=256-row tiles still fit; else stream 2048 cols
    if v <= 2048 or v * work_bytes * 256 <= budget:
        tile_v = v
    else:
        tile_v = 2048                                       # multiple of 128

    rows = budget // max(1, tile_v * work_bytes)
    rows = max(row_mult, (rows // row_mult) * row_mult)
    rows = min(rows, 1024)
    tile_n = n if n <= rows else rows                       # full dim is always legal
    return tile_n, tile_v, vmem_limit


# ----------------------------- wrapper ----------------------------------------------
@functools.partial(jax.jit, static_argnames=("tile_n", "tile_v", "vmem_limit"))
def _resource_aware_loss_impl(logits, targets, g_att, g_ff, *, tile_n, tile_v, vmem_limit):
    if logits.ndim == 3:
        logits = logits.reshape(-1, logits.shape[-1])
        targets = targets.reshape(-1)
    n, v = logits.shape
    num_layers = g_att.shape[0]

    total_row_tiles = pl.cdiv(n, tile_n)
    num_splits = NUM_SPLITS if total_row_tiles >= NUM_SPLITS else 1
    rt_per_split = pl.cdiv(total_row_tiles, num_splits)
    nk = pl.cdiv(v, tile_v)
    v_ragged = (v % tile_v) != 0

    targets2d = targets.astype(jnp.int32).reshape(n, 1)

    kernel = functools.partial(
        _ce_kernel, n_rows=n, n_cols=v, tile_n=tile_n, tile_v=tile_v,
        rt_per_split=rt_per_split, v_ragged=v_ragged)

    psum, pcnt = pl.pallas_call(
        kernel,
        out_shape=(jax.ShapeDtypeStruct((num_splits, 1, 1), jnp.float32),
                   jax.ShapeDtypeStruct((num_splits, 1, 1), jnp.float32)),
        grid=(num_splits, rt_per_split, nk),
        in_specs=[
            # logits row x vocab tile (streamed, auto double-buffered)
            pl.BlockSpec((tile_n, tile_v), lambda c, i, k: (c * rt_per_split + i, k)),
            # targets row tile (resident across the vocab axis)
            pl.BlockSpec((tile_n, 1), lambda c, i, k: (c * rt_per_split + i, 0)),
        ],
        out_specs=(
            # one partial-sum / partial-count row per core split
            pl.BlockSpec((None, 1, 1), lambda c, i, k: (c, 0, 0)),
            pl.BlockSpec((None, 1, 1), lambda c, i, k: (c, 0, 0)),
        ),
        scratch_shapes=[
            pltpu.VMEM((tile_n, 1), jnp.float32),   # running row max
            pltpu.VMEM((tile_n, 1), jnp.float32),   # running exp sum
            pltpu.VMEM((tile_n, 1), jnp.float32),   # accumulated target logit
        ],
        compiler_params=pltpu.CompilerParams(
            dimension_semantics=("parallel", "arbitrary", "arbitrary"),
            vmem_limit_bytes=int(vmem_limit),
        ),
    )(logits, targets2d)

    # combine per-core partials + divide (mean over non-ignored rows)
    loss_sum = jnp.sum(psum)
    valid_cnt = jnp.sum(pcnt)
    # NOTE: if every target == IGNORE_INDEX this returns 0.0 (PyTorch returns NaN).
    task_loss = loss_sum / jnp.maximum(valid_cnt, 1.0)

    # uniform-cost-model resource term (O(num_layers) scalar work; fuses with the
    # combine/divide above into one tiny XLA epilogue)
    g_att_f = g_att.astype(jnp.float32)
    g_ff_f = g_ff.astype(jnp.float32)
    per_layer = (g_att_f * MEMORY_COST_BASE
                 + (1.0 - g_att_f) * RECOMPUTATION_COST_BASE
                 + g_ff_f * MEMORY_COST_BASE
                 + (1.0 - g_ff_f) * RECOMPUTATION_COST_BASE)
    resource_loss = jnp.sum(per_layer)
    if NORMALIZE_COSTS and num_layers > 0:
        resource_loss = resource_loss / float(num_layers)

    total_loss = task_loss + LAMBDA_RESOURCE * resource_loss
    return total_loss, task_loss, resource_loss


def resource_aware_loss(logits, targets, g_att, g_ff, tile_n=None, tile_v=None):
    """Forward pass of ResourceAwareLoss (uniform cost model, defaults)."""
    v = logits.shape[-1]
    n = 1
    for d in logits.shape[:-1]:
        n *= int(d)
    itemsize = jnp.dtype(logits.dtype).itemsize
    auto_tn, auto_tv, vmem_limit = _choose_tiling(n, v, itemsize)
    tile_n = auto_tn if tile_n is None else min(int(tile_n), n)
    tile_v = auto_tv if tile_v is None else min(int(tile_v), v)
    return _resource_aware_loss_impl(logits, targets, g_att, g_ff,
                                     tile_n=tile_n, tile_v=tile_v,
                                     vmem_limit=vmem_limit)


# ----------------------------- reference (plain JAX) for sanity --------------------
def _reference(logits, targets, g_att, g_ff):
    lg = logits.reshape(-1, logits.shape[-1]).astype(jnp.float32)
    tg = targets.reshape(-1)
    lse = jax.scipy.special.logsumexp(lg, axis=-1)
    safe_t = jnp.where(tg == IGNORE_INDEX, 0, tg)
    tgt = jnp.take_along_axis(lg, safe_t[:, None], axis=-1)[:, 0]
    per = lse - tgt
    valid = (tg != IGNORE_INDEX).astype(jnp.float32)
    task = jnp.sum(per * valid) / jnp.maximum(jnp.sum(valid), 1.0)
    per_layer = (g_att * MEMORY_COST_BASE + (1 - g_att) * RECOMPUTATION_COST_BASE
                 + g_ff * MEMORY_COST_BASE + (1 - g_ff) * RECOMPUTATION_COST_BASE)
    res = jnp.sum(per_layer) / g_att.shape[0]
    return task + LAMBDA_RESOURCE * res


# ----------------------------- main -------------------------------------------------
if __name__ == "__main__":
    key = jax.random.PRNGKey(0)
    B, S, V, L = 2, 8, 32, 4  # batch, seq, vocab, num transformer layers

    k1, k2, k3, k4 = jax.random.split(key, 4)
    logits = jax.random.normal(k1, (B, S, V), dtype=jnp.float32)
    targets = jax.random.randint(k2, (B, S), 0, V, dtype=jnp.int32)
    # exercise ignore_index masking like nn.CrossEntropyLoss(ignore_index=-100)
    targets = targets.at[0, 0].set(IGNORE_INDEX)

    # gate probabilities per layer (attention and feed-forward gates)
    g_att = jax.nn.sigmoid(jax.random.normal(k3, (L,), dtype=jnp.float32))
    g_ff = jax.nn.sigmoid(jax.random.normal(k4, (L,), dtype=jnp.float32))

    # 1) auto-tiled path, f32 logits (single row tile, single vocab tile)
    total, task, res = resource_aware_loss(logits, targets, g_att, g_ff)
    total = jax.block_until_ready(total)
    ref = _reference(logits, targets, g_att, g_ff)
    assert jnp.allclose(total, ref, rtol=1e-4, atol=1e-4), (total, ref)

    # 2) multi-row-tile path with ragged last tile + bf16 logits (2-core split exercised)
    S2 = 13                                      # N = 26, tile_n = 16 -> 2 row tiles
    k5, k6 = jax.random.split(k1)
    logits2 = jax.random.normal(k5, (B, S2, V), dtype=jnp.float32).astype(jnp.bfloat16)
    targets2 = jax.random.randint(k6, (B, S2), 0, V, dtype=jnp.int32)
    targets2 = targets2.at[1, 3].set(IGNORE_INDEX)
    total2, _, _ = resource_aware_loss(logits2, targets2, g_att, g_ff, tile_n=16)
    total2 = jax.block_until_ready(total2)
    ref2 = _reference(logits2, targets2, g_att, g_ff)
    assert jnp.allclose(total2, ref2, rtol=1e-4, atol=1e-4), (total2, ref2)

    # 3) vocab-streamed online-LSE path with a ragged vocab tile (V=200, tile_v=128)
    S3, V3 = 16, 200                              # N = 32, 2 row tiles, 2 vocab tiles
    k7, k8 = jax.random.split(k2)
    logits3 = jax.random.normal(k7, (B, S3, V3), dtype=jnp.float32)
    targets3 = jax.random.randint(k8, (B, S3), 0, V3, dtype=jnp.int32)
    targets3 = targets3.at[0, 5].set(IGNORE_INDEX)
    total3, _, _ = resource_aware_loss(logits3, targets3, g_att, g_ff,
                                       tile_n=16, tile_v=128)
    total3 = jax.block_until_ready(total3)
    ref3 = _reference(logits3, targets3, g_att, g_ff)
    assert jnp.allclose(total3, ref3, rtol=1e-4, atol=1e-4), (total3, ref3)

    print("KERNEL_OK")
</pallas_src>

<mosaic_0001>
module attributes {stable_mosaic.version = 11 : i64} {
  func.func @_ce_kernel(%arg0: i32, %arg1: i32, %arg2: i32, %arg3: memref<16x32xf32, #tpu.memory_space<vmem>>, %arg4: memref<16x1xi32, #tpu.memory_space<vmem>>, %arg5: memref<1x1x1xf32, #tpu.memory_space<vmem>>, %arg6: memref<1x1x1xf32, #tpu.memory_space<vmem>>, %arg7: memref<16x1xf32, #tpu.memory_space<vmem>>, %arg8: memref<16x1xf32, #tpu.memory_space<vmem>>, %arg9: memref<16x1xf32, #tpu.memory_space<vmem>>) attributes {dimension_semantics = [#tpu.dimension_semantics<parallel>, #tpu.dimension_semantics<arbitrary>, #tpu.dimension_semantics<arbitrary>], iteration_bounds = array<i64: 1, 1, 1>, scalar_prefetch = 0 : i64, scratch_operands = 3 : i64, tpu.core_type = #tpu.core_type<tc>, window_params = [{transform_indices = @transform_0, window_bounds = array<i64: 16, 32>}, {transform_indices = @transform_1, window_bounds = array<i64: 16, 1>}, {transform_indices = @transform_2, window_bounds = array<i64: 1, 1, 1>}, {transform_indices = @transform_3, window_bounds = array<i64: 1, 1, 1>}]} {
    %c0_i32 = arith.constant 0 : i32
    %0 = arith.cmpi eq, %arg1, %c0_i32 : i32
    %c0_i32_0 = arith.constant 0 : i32
    %1 = arith.cmpi eq, %arg2, %c0_i32_0 : i32
    %2 = arith.andi %0, %1 : i1
    %3 = arith.extui %2 : i1 to i32
    %c0_i32_1 = arith.constant 0 : i32
    %4 = arith.cmpi ne, %3, %c0_i32_1 : i32
    scf.if %4 {
      %cst_24 = arith.constant 0.000000e+00 : f32
      %42 = vector.broadcast %cst_24 : f32 to vector<1x1xf32>
      %c0_25 = arith.constant 0 : index
      %c0_26 = arith.constant 0 : index
      %c0_27 = arith.constant 0 : index
      %43 = vector.load %arg5[%c0_25, %c0_26, %c0_27] : memref<1x1x1xf32, #tpu.memory_space<vmem>>, vector<1x1x1xf32>
      %44 = vector.shape_cast %43 : vector<1x1x1xf32> to vector<1x1xf32>
      %45 = vector.shape_cast %42 : vector<1x1xf32> to vector<1x1x1xf32>
      tpu.vector_store %arg5[%c0_25, %c0_26, %c0_27], %45 {strides = array<i32>} : memref<1x1x1xf32, #tpu.memory_space<vmem>>, vector<1x1x1xf32>,
      %cst_28 = arith.constant 0.000000e+00 : f32
      %46 = vector.broadcast %cst_28 : f32 to vector<1x1xf32>
      %c0_29 = arith.constant 0 : index
      %c0_30 = arith.constant 0 : index
      %c0_31 = arith.constant 0 : index
      %47 = vector.load %arg6[%c0_29, %c0_30, %c0_31] : memref<1x1x1xf32, #tpu.memory_space<vmem>>, vector<1x1x1xf32>
      %48 = vector.shape_cast %47 : vector<1x1x1xf32> to vector<1x1xf32>
      %49 = vector.shape_cast %46 : vector<1x1xf32> to vector<1x1x1xf32>
      tpu.vector_store %arg6[%c0_29, %c0_30, %c0_31], %49 {strides = array<i32>} : memref<1x1x1xf32, #tpu.memory_space<vmem>>, vector<1x1x1xf32>,
    } else {
    }
    %c0_i32_2 = arith.constant 0 : i32
    %5 = arith.cmpi eq, %arg2, %c0_i32_2 : i32
    %6 = arith.extui %5 : i1 to i32
    %c0_i32_3 = arith.constant 0 : i32
    %7 = arith.cmpi ne, %6, %c0_i32_3 : i32
    scf.if %7 {
      %cst_24 = arith.constant -3.40282347E+38 : f32
      %42 = vector.broadcast %cst_24 : f32 to vector<16x1xf32>
      %c0_25 = arith.constant 0 : index
      %c0_26 = arith.constant 0 : index
      %43 = vector.load %arg7[%c0_25, %c0_26] : memref<16x1xf32, #tpu.memory_space<vmem>>, vector<16x1xf32>
      tpu.vector_store %arg7[%c0_25, %c0_26], %42 {strides = array<i32>} : memref<16x1xf32, #tpu.memory_space<vmem>>, vector<16x1xf32>,
      %cst_27 = arith.constant 0.000000e+00 : f32
      %44 = vector.broadcast %cst_27 : f32 to vector<16x1xf32>
      %c0_28 = arith.constant 0 : index
      %c0_29 = arith.constant 0 : index
      %45 = vector.load %arg8[%c0_28, %c0_29] : memref<16x1xf32, #tpu.memory_space<vmem>>, vector<16x1xf32>
      tpu.vector_store %arg8[%c0_28, %c0_29], %44 {strides = array<i32>} : memref<16x1xf32, #tpu.memory_space<vmem>>, vector<16x1xf32>,
      %cst_30 = arith.constant 0.000000e+00 : f32
      %46 = vector.broadcast %cst_30 : f32 to vector<16x1xf32>
      %c0_31 = arith.constant 0 : index
      %c0_32 = arith.constant 0 : index
      %47 = vector.load %arg9[%c0_31, %c0_32] : memref<16x1xf32, #tpu.memory_space<vmem>>, vector<16x1xf32>
      tpu.vector_store %arg9[%c0_31, %c0_32], %46 {strides = array<i32>} : memref<16x1xf32, #tpu.memory_space<vmem>>, vector<16x1xf32>,
    } else {
    }
    %c0 = arith.constant 0 : index
    %c0_4 = arith.constant 0 : index
    %8 = vector.load %arg3[%c0, %c0_4] : memref<16x32xf32, #tpu.memory_space<vmem>>, vector<16x32xf32>
    %c0_5 = arith.constant 0 : index
    %c0_6 = arith.constant 0 : index
    %9 = vector.load %arg4[%c0_5, %c0_6] : memref<16x1xi32, #tpu.memory_space<vmem>>, vector<16x1xi32>
    %10 = tpu.iota {dimensions = array<i32: 1>} : vector<16x32xi32>
    %c32_i32 = arith.constant 32 : i32
    %11 = arith.muli %arg2, %c32_i32 : i32
    %12 = vector.broadcast %11 : i32 to vector<16x32xi32>
    %13 = arith.addi %10, %12 : vector<16x32xi32>
    %cst = arith.constant dense<0xFF800000> : vector<16xf32>
    %14 = vector.multi_reduction <maximumf>, %8, %cst [1] : vector<16x32xf32> to vector<16xf32>
    %15 = vector.shape_cast %14 : vector<16xf32> to vector<16x1xf32>
    %c0_7 = arith.constant 0 : index
    %c0_8 = arith.constant 0 : index
    %16 = vector.load %arg7[%c0_7, %c0_8] : memref<16x1xf32, #tpu.memory_space<vmem>>, vector<16x1xf32>
    %17 = arith.maximumf %16, %15 : vector<16x1xf32>
    %18 = vector.broadcast %17 : vector<16x1xf32> to vector<16x32xf32>
    %19 = arith.subf %8, %18 : vector<16x32xf32>
    %20 = math.exp %19 : vector<16x32xf32>
    %c0_9 = arith.constant 0 : index
    %c0_10 = arith.constant 0 : index
    %21 = vector.load %arg8[%c0_9, %c0_10] : memref<16x1xf32, #tpu.memory_space<vmem>>, vector<16x1xf32>
    %22 = arith.subf %16, %17 : vector<16x1xf32>
    %23 = math.exp %22 : vector<16x1xf32>
    %24 = arith.mulf %21, %23 : vector<16x1xf32>
    %cst_11 = arith.constant dense<0.000000e+00> : vector<16xf32>
    %25 = vector.multi_reduction <add>, %20, %cst_11 [1] : vector<16x32xf32> to vector<16xf32>
    %26 = vector.shape_cast %25 : vector<16xf32> to vector<16x1xf32>
    %27 = arith.addf %24, %26 : vector<16x1xf32>
    %c0_12 = arith.constant 0 : index
    %c0_13 = arith.constant 0 : index
    %28 = vector.load %arg8[%c0_12, %c0_13] : memref<16x1xf32, #tpu.memory_space<vmem>>, vector<16x1xf32>
    tpu.vector_store %arg8[%c0_12, %c0_13], %27 {strides = array<i32>} : memref<16x1xf32, #tpu.memory_space<vmem>>, vector<16x1xf32>,
    %c0_14 = arith.constant 0 : index
    %c0_15 = arith.constant 0 : index
    %29 = vector.load %arg7[%c0_14, %c0_15] : memref<16x1xf32, #tpu.memory_space<vmem>>, vector<16x1xf32>
    tpu.vector_store %arg7[%c0_14, %c0_15], %17 {strides = array<i32>} : memref<16x1xf32, #tpu.memory_space<vmem>>, vector<16x1xf32>,
    %30 = vector.broadcast %9 : vector<16x1xi32> to vector<16x32xi32>
    %31 = arith.cmpi eq, %13, %30 : vector<16x32xi32>
    %c0_16 = arith.constant 0 : index
    %c0_17 = arith.constant 0 : index
    %32 = vector.load %arg9[%c0_16, %c0_17] : memref<16x1xf32, #tpu.memory_space<vmem>>, vector<16x1xf32>
    %cst_18 = arith.constant 0.000000e+00 : f32
    %33 = vector.broadcast %cst_18 : f32 to vector<16x32xf32>
    %34 = arith.select %31, %8, %33 : vector<16x32xi1>, vector<16x32xf32>
    %cst_19 = arith.constant dense<0.000000e+00> : vector<16xf32>
    %35 = vector.multi_reduction <add>, %34, %cst_19 [1] : vector<16x32xf32> to vector<16xf32>
    %36 = vector.shape_cast %35 : vector<16xf32> to vector<16x1xf32>
    %37 = arith.addf %32, %36 : vector<16x1xf32>
    %c0_20 = arith.constant 0 : index
    %c0_21 = arith.constant 0 : index
    %38 = vector.load %arg9[%c0_20, %c0_21] : memref<16x1xf32, #tpu.memory_space<vmem>>, vector<16x1xf32>
    tpu.vector_store %arg9[%c0_20, %c0_21], %37 {strides = array<i32>} : memref<16x1xf32, #tpu.memory_space<vmem>>, vector<16x1xf32>,
    %c0_i32_22 = arith.constant 0 : i32
    %39 = arith.cmpi eq, %arg2, %c0_i32_22 : i32
    %40 = arith.extui %39 : i1 to i32
    %c0_i32_23 = arith.constant 0 : i32
    %41 = arith.cmpi ne, %40, %c0_i32_23 : i32
    scf.if %41 {
      %c0_24 = arith.constant 0 : index
      %c0_25 = arith.constant 0 : index
      %42 = vector.load %arg7[%c0_24, %c0_25] : memref<16x1xf32, #tpu.memory_space<vmem>>, vector<16x1xf32>
      %c0_26 = arith.constant 0 : index
      %c0_27 = arith.constant 0 : index
      %43 = vector.load %arg8[%c0_26, %c0_27] : memref<16x1xf32, #tpu.memory_space<vmem>>, vector<16x1xf32>
      %44 = math.log %43 : vector<16x1xf32>
      %45 = arith.addf %42, %44 : vector<16x1xf32>
      %c0_28 = arith.constant 0 : index
      %c0_29 = arith.constant 0 : index
      %46 = vector.load %arg9[%c0_28, %c0_29] : memref<16x1xf32, #tpu.memory_space<vmem>>, vector<16x1xf32>
      %47 = arith.subf %45, %46 : vector<16x1xf32>
      %48 = tpu.iota {dimensions = array<i32: 0>} : vector<16x1xi32>
      %c1_i32 = arith.constant 1 : i32
      %49 = arith.muli %arg0, %c1_i32 : i32
      %50 = arith.addi %49, %arg1 : i32
      %c16_i32 = arith.constant 16 : i32
      %51 = arith.muli %50, %c16_i32 : i32
      %52 = vector.broadcast %51 : i32 to vector<16x1xi32>
      %53 = arith.addi %48, %52 : vector<16x1xi32>
      %c16_i32_30 = arith.constant 16 : i32
      %54 = vector.broadcast %c16_i32_30 : i32 to vector<16x1xi32>
      %55 = arith.cmpi slt, %53, %54 : vector<16x1xi32>
      %c-100_i32 = arith.constant -100 : i32
      %56 = vector.broadcast %c-100_i32 : i32 to vector<16x1xi32>
      %57 = arith.cmpi ne, %9, %56 : vector<16x1xi32>
      %58 = arith.andi %55, %57 : vector<16x1xi1>
      %c0_31 = arith.constant 0 : index
      %c0_32 = arith.constant 0 : index
      %c0_33 = arith.constant 0 : index
      %59 = vector.load %arg5[%c0_31, %c0_32, %c0_33] : memref<1x1x1xf32, #tpu.memory_space<vmem>>, vector<1x1x1xf32>
      %60 = vector.shape_cast %59 : vector<1x1x1xf32> to vector<1x1xf32>
      %cst_34 = arith.constant 0.000000e+00 : f32
      %61 = vector.broadcast %cst_34 : f32 to vector<16x1xf32>
      %62 = arith.select %58, %47, %61 : vector<16x1xi1>, vector<16x1xf32>
      %63 = vector.shape_cast %62 : vector<16x1xf32> to vector<1x16x1xf32>
      %cst_35 = arith.constant dense<0.000000e+00> : vector<1xf32>
      %64 = vector.multi_reduction <add>, %63, %cst_35 [1, 2] : vector<1x16x1xf32> to vector<1xf32>
      %65 = vector.shape_cast %64 : vector<1xf32> to vector<1x1x1xf32>
      %66 = vector.extract %65[0, 0, 0] : f32 from vector<1x1x1xf32>
      %67 = vector.broadcast %66 : f32 to vector<1x1xf32>
      %68 = arith.addf %60, %67 : vector<1x1xf32>
      %c0_36 = arith.constant 0 : index
      %c0_37 = arith.constant 0 : index
      %c0_38 = arith.constant 0 : index
      %69 = vector.load %arg5[%c0_36, %c0_37, %c0_38] : memref<1x1x1xf32, #tpu.memory_space<vmem>>, vector<1x1x1xf32>
      %70 = vector.shape_cast %69 : vector<1x1x1xf32> to vector<1x1xf32>
      %71 = vector.shape_cast %68 : vector<1x1xf32> to vector<1x1x1xf32>
      tpu.vector_store %arg5[%c0_36, %c0_37, %c0_38], %71 {strides = array<i32>} : memref<1x1x1xf32, #tpu.memory_space<vmem>>, vector<1x1x1xf32>,
      %c0_39 = arith.constant 0 : index
      %c0_40 = arith.constant 0 : index
      %c0_41 = arith.constant 0 : index
      %72 = vector.load %arg6[%c0_39, %c0_40, %c0_41] : memref<1x1x1xf32, #tpu.memory_space<vmem>>, vector<1x1x1xf32>
      %73 = vector.shape_cast %72 : vector<1x1x1xf32> to vector<1x1xf32>
      %cst_42 = arith.constant 1.000000e+00 : f32
      %cst_43 = arith.constant 0.000000e+00 : f32
      %74 = vector.broadcast %cst_42 : f32 to vector<16x1xf32>
      %75 = vector.broadcast %cst_43 : f32 to vector<16x1xf32>
      %76 = arith.select %58, %74, %75 : vector<16x1xi1>, vector<16x1xf32>
      %77 = vector.shape_cast %76 : vector<16x1xf32> to vector<1x16x1xf32>
      %cst_44 = arith.constant dense<0.000000e+00> : vector<1xf32>
      %78 = vector.multi_reduction <add>, %77, %cst_44 [1, 2] : vector<1x16x1xf32> to vector<1xf32>
      %79 = vector.shape_cast %78 : vector<1xf32> to vector<1x1x1xf32>
      %80 = vector.extract %79[0, 0, 0] : f32 from vector<1x1x1xf32>
      %81 = vector.broadcast %80 : f32 to vector<1x1xf32>
      %82 = arith.addf %73, %81 : vector<1x1xf32>
      %c0_45 = arith.constant 0 : index
      %c0_46 = arith.constant 0 : index
      %c0_47 = arith.constant 0 : index
      %83 = vector.load %arg6[%c0_45, %c0_46, %c0_47] : memref<1x1x1xf32, #tpu.memory_space<vmem>>, vector<1x1x1xf32>
      %84 = vector.shape_cast %83 : vector<1x1x1xf32> to vector<1x1xf32>
      %85 = vector.shape_cast %82 : vector<1x1xf32> to vector<1x1x1xf32>
      tpu.vector_store %arg6[%c0_45, %c0_46, %c0_47], %85 {strides = array<i32>} : memref<1x1x1xf32, #tpu.memory_space<vmem>>, vector<1x1x1xf32>,
    } else {
    }
    return
  }
  func.func @transform_0(%arg0: i32, %arg1: i32, %arg2: i32) -> (i32, i32) {
    %c1_i32 = arith.constant 1 : i32
    %0 = arith.muli %arg0, %c1_i32 : i32
    %1 = arith.addi %0, %arg1 : i32
    %c0_i32 = arith.constant 0 : i32
    return %1, %arg2 : i32, i32
  }
  func.func @transform_1(%arg0: i32, %arg1: i32, %arg2: i32) -> (i32, i32) {
    %c1_i32 = arith.constant 1 : i32
    %0 = arith.muli %arg0, %c1_i32 : i32
    %1 = arith.addi %0, %arg1 : i32
    %c0_i32 = arith.constant 0 : i32
    %c0_i32_0 = arith.constant 0 : i32
    return %1, %c0_i32 : i32, i32
  }
  func.func @transform_2(%arg0: i32, %arg1: i32, %arg2: i32) -> (i32, i32, i32) {
    %c0_i32 = arith.constant 0 : i32
    %c0_i32_0 = arith.constant 0 : i32
    %c0_i32_1 = arith.constant 0 : i32
    return %arg0, %c0_i32, %c0_i32_0 : i32, i32, i32
  }
  func.func @transform_3(%arg0: i32, %arg1: i32, %arg2: i32) -> (i32, i32, i32) {
    %c0_i32 = arith.constant 0 : i32
    %c0_i32_0 = arith.constant 0 : i32
    %c0_i32_1 = arith.constant 0 : i32
    return %arg0, %c0_i32, %c0_i32_0 : i32, i32, i32
  }
}

</mosaic_0001>

<bundles_post_ra>
// kernel: _resource_aware_loss_impl.1
= control target key start
LH: loop header
LB: loop body
LE: loop exit
PB: predicated region body
PF: predicated region fallthrough
CT: control target
= control target key end

     0   :  { %9 = vsyncpa [#allocation6], 0  ;;  %vm87_vm0 = vcmask 261120   ;;  %s441_s0 = inlined_call_operand.vmem [shape: f32[16,32], index: 0, kind: input, shape index: {}]   ;;  %s442_s1 = inlined_call_operand.vmem [shape: s32[16,1], index: 1, kind: input, shape index: {}]   ;;  %s443_s2 = inlined_call_operand.hbm [shape: f32[1,1,1], index: 2, kind: output, shape index: {0}]   ;;  %s444_s3 = inlined_call_operand.hbm [shape: f32[1,1,1], index: 3, kind: output, shape index: {1}]  }
   0x1   :  { %v78_v0 = vld [vmem:[%s441_s0] sm:$0xff]  ;;  %v79_v1 = vld [vmem:[%s441_s0 + $0x8] sm:$0xff] }
   0x2   :  { %10 = vsyncpa [#allocation8], 0  ;;  %v88_v2 = vsel %vm87_vm0, %v78_v0, -inf  ;;  %v91_v3 = vsel %vm87_vm0, %v79_v1, -inf  ;;  %vm71_vm1 = vcmask 7168   ;;  %v339_v5 = vmov 0  }
   0x3   :  { %89 = vmax.xlane.f32.xlu0 %v88_v2  ;;  %v338_v4 = vmov -3.4028235e+38   ;;  %276 = vset.pattern.permute.xlu1 %v339_v5  ;;  %v340_v6 = vmov 0.0   ;;  %v384_v7 = vld [vmem:[%s442_s1] sm:$0xff]  ;;  %v392_v16 = vld [vmem:[%s442_s1 + $0x8] sm:$0xff]  ;;  %v82_v17 = vlaneseq  ;;  %vm65_vm6 = vcmask 0  }
   0x4   :  { %72 = vst.msk [vmem:[#allocation2] sm:$0xff] %vm71_vm1, %v338_v4  ;;  %73 = vst.msk [vmem:[#allocation2 + $0x8] sm:$0xff] %vm71_vm1, %v338_v4  ;;  %277 = vset.pattern.permute.xlu0 %v339_v5  ;;  %vm186_vm4 = vcmp.ne.s32.totalorder %v384_v7, 4294967196  ;;  %vm187_vm5 = vcmp.ne.s32.totalorder %v392_v16, 4294967196  ;;  %s341_s1 = smov [#allocation5]   ;;  %s342_s21 = smov [#allocation7]  }
   0x5   :  { %74 = vst.msk [vmem:[#allocation3] sm:$0xff] %vm71_vm1, %v340_v6  ;;  %75 = vst.msk [vmem:[#allocation3 + $0x8] sm:$0xff] %vm71_vm1, %v340_v6  ;;  %v83_v18 = vand.u32 127, %v82_v17  ;;  %v210_v4 = vsel %vm186_vm4, 1.0, %v340_v6  ;;  %v211_v5 = vsel %vm187_vm5, 1.0, %v340_v6  ;;  %s233_s19 = sshll.u32 %s341_s1, 4  ;;  %s234_s19 = int_to_ptr.vmem [resolvable:$true] %s233_s19 }
   0x6   :  { %76 = vst.msk [vmem:[#allocation4] sm:$0xff] %vm71_vm1, %v340_v6  ;;  %77 = vst.msk [vmem:[#allocation4 + $0x8] sm:$0xff] %vm71_vm1, %v340_v6  ;;  %s243_s22 = sshll.u32 %s342_s21, 4  ;;  %s290_s24 = scalar_lea.vmem %s234_s19, 16  ;;  %s244_s22 = int_to_ptr.vmem [resolvable:$true] %s243_s22 }
   0x7   :  { %92 = vmax.xlane.f32.xlu0 %v91_v3  ;;  %66 = vst.msk [vmem:[#allocation5] sm:$0x1] %vm65_vm6, %v340_v6  ;;  %67 = vst.msk [vmem:[#allocation7] sm:$0x1] %vm65_vm6, %v340_v6  ;;  %p291_p0 = scmp.ne.s32.totalorder %s234_s19, %s290_s24  ;;  %s294_s25 = scalar_lea.vmem %s234_s19, 32 }
   0x8   :  { %p295_p1 = scmp.lt.s32.totalorder %s234_s19, %s234_s19  ;;  %p296_p2 = scmp.lt.s32.totalorder %s294_s25, %s290_s24 }
   0xa   :  { %p297_p3 = por %p296_p2, %p295_p1 }
   0xb   :  { %v94_v8 = vld [vmem:[#allocation2] sm:$0xff]  ;;  %v95_v11 = vld [vmem:[#allocation2 + $0x8] sm:$0xff] }
   0xc   :  { %v114_v41 = vld [vmem:[#allocation3] sm:$0xff]  ;;  %v115_v45 = vld [vmem:[#allocation3 + $0x8] sm:$0xff]  ;;  %p298_p4 = pnand %p297_p3, %p291_p0 }
   0xd   :  { %v145_v35 = vld [vmem:[#allocation4] sm:$0xff]  ;;  %v146_v50 = vld [vmem:[#allocation4 + $0x8] sm:$0xff] }
  0x1d   :  { %138 = vperm.xlu0 %277, %v384_v7   ;;  %v213_v7 = vsel %vm71_vm1, %v211_v5, 0.0 }
  0x90   :  { %v90_v9 = vpop.xlane.xlu0 %89 }
  0x91   :  { %v96_v10 = vmax.f32 %v94_v8, %v90_v9 }
  0x93   :  { %v116_v12 = vsub.f32 %v94_v8, %v96_v10  ;;  %135 = vst.msk [vmem:[#allocation2] sm:$0xff] %vm71_vm1, %v96_v10  ;;  %100 = vperm.xlu1 %276, %v96_v10  }
  0x94   :  { %v93_v13 = vpop.xlane.xlu0 %92 }
  0x95   :  { %v97_v14 = vmax.f32 %v95_v11, %v93_v13  ;;  %v118_v38 = vmul.f32 1.442695, %v116_v12 }
  0x97   :  { %v117_v15 = vsub.f32 %v95_v11, %v97_v14  ;;  %136 = vst.msk [vmem:[#allocation2 + $0x8] sm:$0xff] %vm71_vm1, %v97_v14  ;;  %105 = vperm.xlu1 %276, %v97_v14   ;;  %v212_v11 = vsel %vm71_vm1, %v210_v4, 0.0 }
  0x98   :  { %v214_v13 = vadd.f32 %v213_v7, %v212_v11 }
  0x99   :  { %v120_v39 = vmul.f32 1.442695, %v117_v15 }
  0x9a   :  { %v162_v57 = vld [vmem:[#allocation2] sm:$0xff] }
  0x9b   :  { %141 = vperm.xlu1 %276, %v392_v16  }
  0x9c   :  { %v139_v19 = vpop.permute.xlu0 %138 }
  0x9d   :  { %vm143_vm2 = vcmp.eq.s32.totalorder %v83_v18, %v139_v19 }
  0x9e   :  { %v147_v20 = vsel %vm143_vm2, %v78_v0, 0.0  ;;  %v163_v63 = vld [vmem:[#allocation2 + $0x8] sm:$0xff] }
  0x9f   :  { %v149_v21 = vsel %vm87_vm0, %v147_v20, 0.0 }
  0xa0   :  { %150 = vadd.xlane.f32.xlu0 %v149_v21 }
 0x112   :  { %v101_v22 = vpop.permute.xlu1 %100 }
 0x113   :  { %v108_v23 = vsub.f32 %v78_v0, %v101_v22 }
 0x115   :  { %v110_v24 = vmul.f32 1.442695, %v108_v23 }
 0x116   :  { %v106_v25 = vpop.permute.xlu1 %105 }
 0x117   :  { %278 = vpow2.f32 %v110_v24  ;;  %v109_v26 = vsub.f32 %v79_v1, %v106_v25 }
 0x119   :  { %v112_v27 = vmul.f32 1.442695, %v109_v26 }
 0x11a   :  { %v142_v29 = vpop.permute.xlu1 %141 }
 0x11b   :  { %280 = vpow2.f32 %v112_v27  ;;  %vm144_vm3 = vcmp.eq.s32.totalorder %v83_v18, %v142_v29 }
 0x11c   :  { %v148_v33 = vsel %vm144_vm3, %v79_v1, 0.0  ;;  %282 = vpow2.f32 %v118_v38 }
 0x11d   :  { %v152_v34 = vsel %vm87_vm0, %v148_v33, 0.0  ;;  %284 = vpow2.f32 %v120_v39 }
 0x121   :  { %v279_v28 = vpop.eup %278 }
 0x122   :  { %v124_v30 = vsel %vm87_vm0, %v279_v28, 0.0  ;;  %v190_v28 = vld [vmem:[#allocation5] sm:$0x1] }
 0x123   :  { %125 = vadd.xlane.f32.xlu1 %v124_v30  ;;  %v209_v30 = vld [vmem:[#allocation7] sm:$0x1] }
 0x125   :  { %v281_v31 = vpop.eup %280 }
 0x126   :  { %v127_v32 = vsel %vm87_vm0, %v281_v31, 0.0  ;;  %v283_v40 = vpop.eup %282 }
 0x127   :  { %128 = vadd.xlane.f32.xlu1 %v127_v32  ;;  %v122_v42 = vmul.f32 %v283_v40, %v114_v41  ;;  %v285_v43 = vpop.eup %284 }
 0x128   :  { %v123_v47 = vmul.f32 %v285_v43, %v115_v45 }
 0x12b   :  { %153 = vadd.xlane.f32.xlu1 %v152_v34 }
 0x12d   :  { %v151_v36 = vpop.xlane.xlu0 %150 }
 0x12e   :  { %v155_v37 = vadd.f32 %v151_v36, %v145_v35 }
 0x130   :  { %157 = vst.msk [vmem:[#allocation4] sm:$0xff] %vm71_vm1, %v155_v37 }
 0x137   :  { %v172_v58 = vld [vmem:[#allocation4] sm:$0xff] }
 0x1b0   :  { %v126_v44 = vpop.xlane.xlu1 %125 }
 0x1b1   :  { %v130_v46 = vadd.f32 %v126_v44, %v122_v42 }
 0x1b3   :  { %133 = vst.msk [vmem:[#allocation3] sm:$0xff] %vm71_vm1, %v130_v46 }
 0x1b4   :  { %v129_v48 = vpop.xlane.xlu1 %128 }
 0x1b5   :  { %v131_v49 = vadd.f32 %v129_v48, %v123_v47 }
 0x1b7   :  { %134 = vst.msk [vmem:[#allocation3 + $0x8] sm:$0xff] %vm71_vm1, %v131_v49 }
 0x1b8   :  { %v154_v51 = vpop.xlane.xlu1 %153 }
 0x1b9   :  { %v156_v52 = vadd.f32 %v154_v51, %v146_v50 }
 0x1ba   :  { %v164_v53 = vld [vmem:[#allocation3] sm:$0xff] }
 0x1bb   :  { %158 = vst.msk [vmem:[#allocation4 + $0x8] sm:$0xff] %vm71_vm1, %v156_v52  ;;  %286 = vlog2.f32 %v164_v53 }
 0x1be   :  { %v165_v54 = vld [vmem:[#allocation3 + $0x8] sm:$0xff] }
 0x1bf   :  { %288 = vlog2.f32 %v165_v54 }
 0x1c2   :  { %v173_v1 = vld [vmem:[#allocation4 + $0x8] sm:$0xff] }
 0x1c5   :  { %v287_v55 = vpop.eup %286 }
 0x1c6   :  { %v167_v56 = vmul.f32 0.6931472, %v287_v55 }
 0x1c8   :  { %v170_v59 = vadd.f32 %v167_v56, %v162_v57 }
 0x1c9   :  { %v289_v60 = vpop.eup %288 }
 0x1ca   :  { %v169_v61 = vmul.f32 0.6931472, %v289_v60  ;;  %v174_v62 = vsub.f32 %v170_v59, %v172_v58 }
 0x1cc   :  { %v171_v0 = vadd.f32 %v169_v61, %v163_v63  ;;  %v191_v3 = vsel %vm186_vm4, %v174_v62, 0.0 }
 0x1cd   :  { %v193_v9 = vsel %vm71_vm1, %v191_v3, 0.0 }
 0x1ce   :  { %v175_v2 = vsub.f32 %v171_v0, %v173_v1 }
 0x1d0   :  { %v192_v8 = vsel %vm187_vm5, %v175_v2, 0.0 }
 0x1d1   :  { %v194_v10 = vsel %vm71_vm1, %v192_v8, 0.0 }
 0x1d2   :  { %v195_v12 = vadd.f32 %v194_v10, %v193_v9 }
 0x1d4   :  { %196 = vadd.xlane.f32.xlu1 %v195_v12 }
 0x1d8   :  { %215 = vadd.xlane.f32.xlu1 %v214_v13 }
 0x261   :  { %v197_v14 = vpop.xlane.xlu1 %196 }
 0x262   :  { %v198_v15 = vrot.slane %v197_v14, 4 }
 0x264   :  { %v199_v16 = vadd.f32 %v198_v15, %v197_v14 }
 0x265   :  { %v216_v17 = vpop.xlane.xlu1 %215 }
 0x266   :  { %v200_v18 = vrot.slane %v199_v16, 2  ;;  %v217_v19 = vrot.slane %v216_v17, 4 }
 0x268   :  { %v218_v20 = vadd.f32 %v217_v19, %v216_v17  ;;  %v201_v21 = vadd.f32 %v200_v18, %v199_v16 }
 0x26a   :  { %v219_v22 = vrot.slane %v218_v20, 2  ;;  %v202_v23 = vrot.slane %v201_v21, 1 }
 0x26c   :  { %v220_v24 = vadd.f32 %v219_v22, %v218_v20  ;;  %v203_v25 = vadd.f32 %v202_v23, %v201_v21 }
 0x26e   :  { %267 = vpush %v203_v25  ;;  %v221_v26 = vrot.slane %v220_v24, 1 }
 0x270   :  { %v222_v27 = vadd.f32 %v221_v26, %v220_v24 }
 0x272   :  { %269 = vpush %v222_v27 }
 0x29f   :  { %s268_s20 = spop %267 }
 0x2a0   :  { %v205_v6 = vstv %s268_s20 }
 0x2a1   :  { %v206_v29 = vadd.f32 %v205_v6, %v190_v28 }
 0x2a3   :  { %208 = vst.msk [vmem:[#allocation5] sm:$0x1] %vm65_vm6, %v206_v29  ;;  %s270_s23 = spop %269 }
 0x2a4   :  { %v224_v31 = vstv %s270_s23 }
 0x2a5   :  { %301 = shalt.err (!%p298_p4)
}
 0x2a6   :  { %s302_s28 = scalar_lea.hbm %s443_s2, 16 }
 0x2a7   :  { %p303_p5 = scmp.ne.s32.totalorder %s443_s2, %s302_s28  ;;  %p306_p6 = scmp.lt.u32.totalorder %s302_s28, %s443_s2 }
 0x2a9   :  { %p308_p7 = pnand %p306_p6, %p303_p5 }
 0x2ab   :  { %311 = shalt.err (!%p308_p7)
}
 0x2ac   :  { %236 = dma.vmem_to_hbm [thread:$0]  %s234_s19, 16, %s443_s2, [#allocation6]   ;;  %v225_v32 = vadd.f32 %v224_v31, %v209_v30 }
 0x2ad   :  { %s312_s8 = scalar_lea.vmem %s244_s22, 16  ;;  %s316_s9 = scalar_lea.vmem %s244_s22, 32 }
 0x2ae   :  { %226 = vst.msk [vmem:[#allocation7] sm:$0x1] %vm65_vm6, %v225_v32  ;;  %p313_p8 = scmp.ne.s32.totalorder %s244_s22, %s312_s8  ;;  %p317_p9 = scmp.lt.s32.totalorder %s244_s22, %s244_s22 }
 0x2af   :  { %p318_p10 = scmp.lt.s32.totalorder %s316_s9, %s312_s8 }
 0x2b1   :  { %p319_p11 = por %p318_p10, %p317_p9 }
 0x2b3   :  { %p320_p12 = pnand %p319_p11, %p313_p8 }
 0x2b5   :  { %323 = shalt.err (!%p320_p12)
}
 0x2b6   :  { %s324_s12 = scalar_lea.hbm %s444_s3, 16 }
 0x2b7   :  { %p325_p13 = scmp.ne.s32.totalorder %s444_s3, %s324_s12  ;;  %p328_p0 = scmp.lt.u32.totalorder %s324_s12, %s444_s3 }
 0x2b9   :  { %p330_p1 = pnand %p328_p0, %p325_p13 }
 0x2bb   :  { %333 = shalt.err (!%p330_p1)
}
 0x2bc   :  { %246 = dma.vmem_to_hbm [thread:$0]  %s244_s22, 16, %s444_s3, [#allocation8]  }
 0x2bd   :  { %334 = dma.done.wait [#allocation6], 16  }
 0x2be   :  { %335 = vsyncadd [#allocation6], 4294967280 }
 0x2bf   :  { %336 = dma.done.wait [#allocation8], 16  }
 0x2c0   :  { %337 = vsyncadd [#allocation8], 4294967280 }
 0x2c1   :  { %253 = vsyncpa [#allocation6], 1 }
 0x2c2   :  { %254 = vsyncpa [#allocation8], 1 }

</bundles_post_ra>
